<compile_context>
chip_gen: v7x
topology: tpu7x:2x2x1
jax: 0.10.0
libtpu: 0.0.40
codegen_flags: <defaults>
</compile_context>

<pallas_src>
import jax
import jax.numpy as jnp
from jax.experimental import pallas as pl
from jax.experimental.pallas import tpu as pltpu


def _round_up(a: int, b: int) -> int:
    return (a + b - 1) // b * b


def lora_linear_kernel(x_ref, w_ref, bias_ref, a_ref, bT_ref, o_ref):
    # x_ref:    (tm, nx)
    # w_ref:    (nx, tn)
    # bias_ref: (1, tn)
    # a_ref:    (nx, r)
    # bT_ref:   (r, tn)   (lora_B.T, pre-transposed in the wrapper)
    # o_ref:    (tm, tn)
    x = x_ref[...]
    acc = jnp.dot(x, w_ref[...], preferred_element_type=jnp.float32)
    acc += bias_ref[...].astype(jnp.float32)
    xa = jnp.dot(x, a_ref[...], preferred_element_type=jnp.float32)
    acc += jnp.dot(xa.astype(bT_ref.dtype), bT_ref[...],
                   preferred_element_type=jnp.float32)
    o_ref[...] = acc.astype(o_ref.dtype)


def lora_conv1d_forward(x, weight, bias, lora_A, lora_B, *,
                        tm=256, tn=512, compute_dtype=None):
    """x: (B, S, nx); weight: (nx, nf); bias: (nf,);
       lora_A: (nx, r); lora_B: (nf, r)."""
    B, S, nx = x.shape
    nf = weight.shape[1]
    r = lora_A.shape[1]
    M = B * S
    out_dtype = x.dtype

    # Effective tiles: big when the problem is big, clamped (but (8,128)-legal)
    # when it is small.  Padded extents are exact multiples of the tiles.
    tm_eff = max(8, min(tm, _round_up(M, 8)))
    tn_eff = max(128, min(tn, _round_up(nf, 128)))
    M_pad = _round_up(M, tm_eff)
    nf_pad = _round_up(nf, tn_eff)

    x2d = x.reshape(M, nx)
    bT = lora_B.T  # (r, nf) -- glue transpose outside the kernel

    if compute_dtype is not None:
        # bf16 operands for the MXU on v6e/v7x; accumulation stays f32.
        x2d = x2d.astype(compute_dtype)
        weight = weight.astype(compute_dtype)
        lora_A = lora_A.astype(compute_dtype)
        bT = bT.astype(compute_dtype)

    if M_pad != M:
        x2d = jnp.pad(x2d, ((0, M_pad - M), (0, 0)))
    if nf_pad != nf:
        weight = jnp.pad(weight, ((0, 0), (0, nf_pad - nf)))
        bias = jnp.pad(bias, (0, nf_pad - nf))
        bT = jnp.pad(bT, ((0, 0), (0, nf_pad - nf)))
    bias2d = bias.reshape(1, nf_pad)

    grid = (M_pad // tm_eff, nf_pad // tn_eff)

    itemsize = jnp.dtype(x2d.dtype).itemsize
    cost = pl.CostEstimate(
        flops=2 * M * nf * (nx + r) + 2 * M * nx * r,
        transcendentals=0,
        bytes_accessed=(x2d.size + weight.size + bT.size + lora_A.size) * itemsize
        + M_pad * nf_pad * jnp.dtype(out_dtype).itemsize,
    )

    out2d = pl.pallas_call(
        lora_linear_kernel,
        out_shape=jax.ShapeDtypeStruct((M_pad, nf_pad), out_dtype),
        grid_spec=pltpu.PrefetchScalarGridSpec(
            num_scalar_prefetch=0,
            grid=grid,
            in_specs=[
                pl.BlockSpec((tm_eff, nx), lambda i, j: (i, 0)),
                pl.BlockSpec((nx, tn_eff), lambda i, j: (0, j)),
                pl.BlockSpec((1, tn_eff), lambda i, j: (0, j)),
                pl.BlockSpec((nx, r), lambda i, j: (0, 0)),
                pl.BlockSpec((r, tn_eff), lambda i, j: (0, j)),
            ],
            out_specs=pl.BlockSpec((tm_eff, tn_eff), lambda i, j: (i, j)),
        ),
        compiler_params=pltpu.CompilerParams(
            dimension_semantics=("parallel", "parallel"),
        ),
        cost_estimate=cost,
    )(x2d, weight, bias2d, lora_A, bT)

    out2d = out2d[:M, :nf]
    return out2d.reshape(B, S, nf)


def _reference(x, weight, bias, lora_A, lora_B):
    base = jnp.einsum("bsn,nf->bsf", x, weight,
                      preferred_element_type=jnp.float32) + bias
    xa = jnp.einsum("bsn,nr->bsr", x, lora_A,
                    preferred_element_type=jnp.float32)
    lora = jnp.einsum("bsr,fr->bsf", xa, lora_B,
                      preferred_element_type=jnp.float32)
    return (base + lora).astype(x.dtype)


if __name__ == "__main__":
    key = jax.random.PRNGKey(0)
    ok = True

    # (B, S, nx, nf, rank): second config exercises padding (M, nf not tile
    # multiples) and the tail-slice path.
    configs = [(2, 8, 32, 32, 4), (2, 7, 64, 96, 4)]

    for cfg_idx, (B, S, nx, nf, rank) in enumerate(configs):
        kx, kw, kb, ka, kb2 = jax.random.split(jax.random.fold_in(key, cfg_idx), 5)

        x = jax.random.normal(kx, (B, S, nx), dtype=jnp.float32)
        weight = jax.random.normal(kw, (nx, nf), dtype=jnp.float32) * 0.05
        bias = jax.random.normal(kb, (nf,), dtype=jnp.float32) * 0.05

        # lora_A: kaiming-uniform-style deterministic init (fan_in = nx)
        bound = jnp.sqrt(6.0 / nx)
        lora_A = jax.random.uniform(ka, (nx, rank), dtype=jnp.float32,
                                    minval=-bound, maxval=bound)
        # Module __init__ sets lora_B to zeros (faithful init):
        lora_B_zero = jnp.zeros((nf, rank), dtype=jnp.float32)
        # Non-zero lora_B so the LoRA path in the kernel is actually exercised:
        lora_B_nz = jax.random.normal(kb2, (nf, rank), dtype=jnp.float32) * 0.1

        for lora_B in (lora_B_zero, lora_B_nz):
            out = lora_conv1d_forward(x, weight, bias, lora_A, lora_B)
            out = jax.block_until_ready(out)
            ref = _reference(x, weight, bias, lora_A, lora_B)
            ok = ok and bool(jnp.allclose(out, ref, atol=1e-4, rtol=1e-4))

    if ok:
        print("KERNEL_OK")
    else:
        print("KERNEL_MISMATCH")
</pallas_src>

<mosaic_0001>
module attributes {stable_mosaic.version = 11 : i64} {
  func.func @lora_linear_kernel(%arg0: i32, %arg1: i32, %arg2: memref<16x32xf32, #tpu.memory_space<vmem>>, %arg3: memref<32x128xf32, #tpu.memory_space<vmem>>, %arg4: memref<1x128xf32, #tpu.memory_space<vmem>>, %arg5: memref<32x4xf32, #tpu.memory_space<vmem>>, %arg6: memref<4x128xf32, #tpu.memory_space<vmem>>, %arg7: memref<16x128xf32, #tpu.memory_space<vmem>>) attributes {dimension_semantics = [#tpu.dimension_semantics<parallel>, #tpu.dimension_semantics<parallel>], iteration_bounds = array<i64: 1, 1>, scalar_prefetch = 0 : i64, scratch_operands = 0 : i64, tpu.core_type = #tpu.core_type<tc>, window_params = [{transform_indices = @transform_0, window_bounds = array<i64: 16, 32>}, {transform_indices = @transform_1, window_bounds = array<i64: 32, 128>}, {transform_indices = @transform_2, window_bounds = array<i64: 1, 128>}, {pipeline_mode = #tpu.pipeline_mode<synchronous>, transform_indices = @transform_3, window_bounds = array<i64: 32, 4>}, {transform_indices = @transform_4, window_bounds = array<i64: 4, 128>}, {transform_indices = @transform_5, window_bounds = array<i64: 16, 128>}]} {
    %c0 = arith.constant 0 : index
    %c0_0 = arith.constant 0 : index
    %0 = vector.load %arg2[%c0, %c0_0] : memref<16x32xf32, #tpu.memory_space<vmem>>, vector<16x32xf32>
    %c0_1 = arith.constant 0 : index
    %c0_2 = arith.constant 0 : index
    %1 = vector.load %arg3[%c0_1, %c0_2] : memref<32x128xf32, #tpu.memory_space<vmem>>, vector<32x128xf32>
    %cst = arith.constant dense<0.000000e+00> : vector<16x128xf32>
    %2 = tpu.matmul %0, %1, %cst {dimension_numbers = #tpu.dot_dimension_numbers<[1], [0], [0], [1], [0, 0, 1, 1], [], []>} : vector<16x32xf32>, vector<32x128xf32>, vector<16x128xf32> -> vector<16x128xf32>
    %c0_3 = arith.constant 0 : index
    %c0_4 = arith.constant 0 : index
    %3 = vector.load %arg4[%c0_3, %c0_4] : memref<1x128xf32, #tpu.memory_space<vmem>>, vector<1x128xf32>
    %4 = vector.broadcast %3 : vector<1x128xf32> to vector<16x128xf32>
    %5 = arith.addf %2, %4 : vector<16x128xf32>
    %c0_5 = arith.constant 0 : index
    %c0_6 = arith.constant 0 : index
    %6 = vector.load %arg5[%c0_5, %c0_6] : memref<32x4xf32, #tpu.memory_space<vmem>>, vector<32x4xf32>
    %cst_7 = arith.constant dense<0.000000e+00> : vector<16x4xf32>
    %7 = tpu.matmul %0, %6, %cst_7 {dimension_numbers = #tpu.dot_dimension_numbers<[1], [0], [0], [1], [0, 0, 1, 1], [], []>} : vector<16x32xf32>, vector<32x4xf32>, vector<16x4xf32> -> vector<16x4xf32>
    %c0_8 = arith.constant 0 : index
    %c0_9 = arith.constant 0 : index
    %8 = vector.load %arg6[%c0_8, %c0_9] : memref<4x128xf32, #tpu.memory_space<vmem>>, vector<4x128xf32>
    %cst_10 = arith.constant dense<0.000000e+00> : vector<16x128xf32>
    %9 = tpu.matmul %7, %8, %cst_10 {dimension_numbers = #tpu.dot_dimension_numbers<[1], [0], [0], [1], [0, 0, 1, 1], [], []>} : vector<16x4xf32>, vector<4x128xf32>, vector<16x128xf32> -> vector<16x128xf32>
    %10 = arith.addf %5, %9 : vector<16x128xf32>
    %c0_11 = arith.constant 0 : index
    %c0_12 = arith.constant 0 : index
    %11 = vector.load %arg7[%c0_11, %c0_12] : memref<16x128xf32, #tpu.memory_space<vmem>>, vector<16x128xf32>
    tpu.vector_store %arg7[%c0_11, %c0_12], %10 {strides = array<i32>} : memref<16x128xf32, #tpu.memory_space<vmem>>, vector<16x128xf32>,
    return
  }
  func.func @transform_0(%arg0: i32, %arg1: i32) -> (i32, i32) {
    %c0_i32 = arith.constant 0 : i32
    %c0_i32_0 = arith.constant 0 : i32
    return %arg0, %c0_i32 : i32, i32
  }
  func.func @transform_1(%arg0: i32, %arg1: i32) -> (i32, i32) {
    %c0_i32 = arith.constant 0 : i32
    %c0_i32_0 = arith.constant 0 : i32
    return %c0_i32, %arg1 : i32, i32
  }
  func.func @transform_2(%arg0: i32, %arg1: i32) -> (i32, i32) {
    %c0_i32 = arith.constant 0 : i32
    %c0_i32_0 = arith.constant 0 : i32
    return %c0_i32, %arg1 : i32, i32
  }
  func.func @transform_3(%arg0: i32, %arg1: i32) -> (i32, i32) {
    %c0_i32 = arith.constant 0 : i32
    %c0_i32_0 = arith.constant 0 : i32
    %c0_i32_1 = arith.constant 0 : i32
    return %c0_i32, %c0_i32_0 : i32, i32
  }
  func.func @transform_4(%arg0: i32, %arg1: i32) -> (i32, i32) {
    %c0_i32 = arith.constant 0 : i32
    %c0_i32_0 = arith.constant 0 : i32
    return %c0_i32, %arg1 : i32, i32
  }
  func.func @transform_5(%arg0: i32, %arg1: i32) -> (i32, i32) {
    %c0_i32 = arith.constant 0 : i32
    return %arg0, %arg1 : i32, i32
  }
}

</mosaic_0001>

<bundles_post_ra>
// kernel: tpu_custom_call.1
= control target key start
LH: loop header
LB: loop body
LE: loop exit
PB: predicated region body
PF: predicated region fallthrough
CT: control target
= control target key end

     0   :  { %10 = vsyncpa [#allocation3], 0  ;;  %s537_s0 = inlined_call_operand.hbm [shape: f32[16,32], index: 0, kind: input, shape index: {}]   ;;  %s538_s1 = inlined_call_operand.vmem [shape: f32[32,128], index: 1, kind: input, shape index: {}]   ;;  %s539_s2 = inlined_call_operand.vmem [shape: f32[1,128], index: 2, kind: input, shape index: {}]   ;;  %s540_s3 = inlined_call_operand.vmem [shape: f32[32,4], index: 3, kind: input, shape index: {}]   ;;  %s541_s4 = inlined_call_operand.vmem [shape: f32[4,128], index: 4, kind: input, shape index: {}]   ;;  %s542_s5 = inlined_call_operand.hbm [shape: f32[16,128], index: 5, kind: output, shape index: {}]  }
   0x1   :  { %11 = vsyncpa [#allocation4], 0  ;;  %s439_s18 = smov [#allocation2]   ;;  %s391_s22 = scalar_lea.hbm %s537_s0, 256 }
   0x2   :  { %s17_s19 = sshll.u32 %s439_s18, 4  ;;  %p392_p0 = scmp.ne.s32.totalorder %s537_s0, %s391_s22  ;;  %s18_s19 = int_to_ptr.vmem [resolvable:$true] %s17_s19 }
   0x3   :  { %p395_p1 = scmp.lt.u32.totalorder %s391_s22, %s537_s0 }
   0x5   :  { %p397_p2 = pnand %p395_p1, %p392_p0 }
   0x7   :  { %400 = shalt.err (!%p397_p2)
}
   0x8   :  { %s401_s27 = scalar_lea.vmem %s18_s19, 256  ;;  %p406_p4 = scmp.lt.s32.totalorder %s18_s19, %s18_s19 }
   0x9   :  { %p402_p3 = scmp.ne.s32.totalorder %s18_s19, %s401_s27  ;;  %p407_p5 = scmp.lt.s32.totalorder %s401_s27, %s401_s27 }
   0xb   :  { %p408_p6 = por %p407_p5, %p406_p4 }
   0xd   :  { %p409_p7 = pnand %p408_p6, %p402_p3 }
   0xf   :  { %412 = shalt.err (!%p409_p7)
}
  0x10   :  { %s440_s28 = smov 128   ;;  %s441_s29 = smov 8  }
  0x11   :  { %23 = dma.hbm_to_vmem [thread:$0]  %s537_s0, 256, %s18_s19, [#allocation3], %s440_s28, %s440_s28, %s441_s29  }
  0x12   :  { %435 = dma.done.wait [#allocation3], 256  }
  0x13   :  { %436 = vsyncadd [#allocation3], 4294967040  ;;  %vm48_vm0 = vcmask 261120   ;;  %v130_v0 = vld [vmem:[%s540_s3] sm:$0xff]  ;;  %v131_v1 = vld [vmem:[%s540_s3 + $0x8] sm:$0xff]  ;;  %vm217_vm1 = vcmask 1043456  }
  0x14   :  { %v132_v2 = vld [vmem:[%s540_s3 + $0x10] sm:$0xff]  ;;  %v375_v3 = vpack.c.bf16 %v131_v1, %v130_v0  ;;  %v133_v4 = vld [vmem:[%s540_s3 + $0x18] sm:$0xff]  ;;  %v35_v5 = vld [vmem:[#allocation2] sm:$0xff]  ;;  %vm210_vm2 = vcmask 31744   ;;  %s442_s24 = smov [#allocation5]  }
  0x15   :  { %v379_v6 = vpack.c.bf16 %v133_v4, %v132_v2  ;;  %359 = vmatprep.mubr.msk.f32.mxu1 %vm48_vm0, %v35_v5  ;;  %v37_v7 = vld [vmem:[%s538_s1] sm:$0xff]  ;;  %v38_v8 = vld [vmem:[%s538_s1 + $0x8] sm:$0xff]  ;;  %v39_v9 = vld [vmem:[%s538_s1 + $0x10] sm:$0xff]  ;;  %348 = vmatprep.mubr.msk.f32.mxu0 %vm48_vm0, %v35_v5  ;;  %s305_s25 = sshll.u32 %s442_s24, 4  ;;  %s306_s25 = int_to_ptr.vmem [resolvable:$true] %s305_s25 }
  0x16   :  { %376 = vmatprep.subr.bf16.mxu1 %v375_v3  ;;  %v367_v10 = vpack.c.bf16 %v38_v8, %v37_v7  ;;  %v40_v11 = vld [vmem:[%s538_s1 + $0x18] sm:$0xff]  ;;  %v36_v13 = vld [vmem:[#allocation2 + $0x8] sm:$0xff]  ;;  %v209_v14 = vld [vmem:[%s541_s4] sm:$0xf]  ;;  %s413_s4 = scalar_lea.vmem %s306_s25, 256  ;;  %p418_p9 = scmp.lt.s32.totalorder %s306_s25, %s306_s25 }
  0x17   :  { %378 = vmatpush3.bf16.msra.mxu1 %v375_v3  ;;  %v371_v12 = vpack.c.bf16 %v40_v11, %v39_v9  ;;  %v317_v17 = vld [vmem:[%s539_s2] ss:$0 sm:$0xff]  ;;  %p414_p8 = scmp.ne.s32.totalorder %s306_s25, %s413_s4  ;;  %p419_p10 = scmp.lt.s32.totalorder %s413_s4, %s413_s4 }
  0x18   :  { %380 = vmatprep.subr.bf16.mxu1 %v379_v6  ;;  %368 = vmatprep.subr.bf16.mxu0 %v367_v10 }
  0x19   :  { %370 = vmatpush3.bf16.msra.mxu0 %v367_v10  ;;  %p420_p11 = por %p419_p10, %p418_p9 }
  0x1a   :  { %372 = vmatprep.subr.bf16.mxu0 %v371_v12 }
  0x1b   :  { %382 = vmatpush3.bf16.msra.mxu1 %v379_v6  ;;  %p421_p12 = pnand %p420_p11, %p414_p8 }
  0x1d   :  { %374 = vmatpush3.bf16.msra.mxu0 %v371_v12 }
  0x1e   :  { %360 = vmatmul.mubr.msk.f32.vlgmr.msra.gmra.mrb[0].mxu1 %vm48_vm0, %v36_v13  ;;  %362 = vmatprep.subr.msk.mxu0 %vm217_vm1, %v209_v14 }
  0x20   :  { %349 = vmatmul.mubr.msk.f32.vlgmr.msra.gmra.mrb[0].mxu0 %vm48_vm0, %v36_v13 }
  0x21   :  { %363 = vmatpush3.msk.msra.mxu0 %vm217_vm1, %v209_v14 }
  0xf1   :  { %v361_v15 = vpop.f32.mrb[0].mxu1 }
  0xf2   :  { %v200_v16 = vpop.f32.mrb[1].mxu1 }
  0xf3   :  { %364 = vmatprep.mubr.msk.f32.mxu0 %vm210_vm2, %v200_v16 }
  0xf4   :  { %365 = vmatmul.mubr.msk.f32.vlgmr.msra.gmra.mrb[0].mxu0 %vm210_vm2, %v361_v15 }
 0x1c7   :  { %v366_v18 = vpop.f32.mrb[0].mxu0 }
 0x1c8   :  { %v383_v19 = vadd.f32 %v366_v18, %v317_v17  ;;  %v287_v20 = vpop.f32.mrb[1].mxu0 }
 0x1c9   :  { %v384_v21 = vadd.f32 %v317_v17, %v287_v20 }
 0x1ca   :  { %299 = vst [vmem:[#allocation5 + $0x8] sm:$0xff] %v383_v19 }
 0x1cb   :  { %298 = vst [vmem:[#allocation5] sm:$0xff] %v384_v21 }
 0x1cc   :  { %424 = shalt.err (!%p421_p12)
}
 0x1cd   :  { %s425_s2 = scalar_lea.hbm %s542_s5, 256 }
 0x1ce   :  { %p426_p13 = scmp.ne.s32.totalorder %s542_s5, %s425_s2  ;;  %p429_p0 = scmp.lt.u32.totalorder %s425_s2, %s542_s5 }
 0x1d0   :  { %p431_p1 = pnand %p429_p0, %p426_p13 }
 0x1d2   :  { %434 = shalt.err (!%p431_p1)
}
 0x1d3   :  { %311 = dma.vmem_to_hbm [thread:$0]  %s306_s25, 256, %s542_s5, [#allocation4], %s440_s28, %s440_s28, %s441_s29  }
 0x1d4   :  { %437 = dma.done.wait [#allocation4], 256  }
 0x1d5   :  { %438 = vsyncadd [#allocation4], 4294967040 }
 0x1d6   :  { %315 = vsyncpa [#allocation3], 1 }
 0x1d7   :  { %316 = vsyncpa [#allocation4], 1 }

</bundles_post_ra>
